<compile_context>
chip_gen: v6e
topology: v6e:2x2x1
jax: 0.10.0
libtpu: 0.0.40
codegen_flags: <defaults>
</compile_context>

<pallas_src>
import numpy as np
import jax
import jax.numpy as jnp
from jax.experimental import pallas as pl
from jax.experimental.pallas import tpu as pltpu

P_DROP = 0.1
D_IN, D_HID, D_OUT = 10, 20, 1

PARAM_ROWS, PARAM_LANES = 16, 128   # packed parameter slab (sublane/lane padded)
ACT_LANES = 128                     # lane-dense activation slab width
OUT_LANES = 128                     # lane-dense output slab width
X_OFF = 0                           # x        -> lanes [0, 10)
MC_OFF = 32                         # m_cached -> lanes [32, 52)
MF_OFF = 64                         # m_fresh  -> lanes [64, 84)


def _mlp_repeatable_dropout_kernel(act_ref, params_ref, out_ref):
    # act_ref:    [B, 128]  lanes 0..9 = x, 32..51 = cached scaled mask, 64..83 = fresh scaled mask
    # params_ref: [16, 128] rows 0..9 = w1, row 10 = b1, row 11 = w2 (as a row), row 12 lane 0 = b2
    # out_ref:    [B, 128]  lane 0 = o1, lane 1 = o2 (== o1), lane 2 = o3, rest zero
    B = out_ref.shape[0]

    act = act_ref[...]
    params = params_ref[...]

    x = act[:, X_OFF:X_OFF + D_IN]                  # [B, 10]
    m_cached = act[:, MC_OFF:MC_OFF + D_HID]        # [B, 20]  mask / (1-p)
    m_fresh = act[:, MF_OFF:MF_OFF + D_HID]         # [B, 20]

    w1 = params[0:D_IN, 0:D_HID]                    # [10, 20]
    b1 = params[D_IN:D_IN + 1, 0:D_HID]             # [1, 20]
    w2 = params[D_IN + 1:D_IN + 2, 0:D_HID]         # [1, 20]  second-layer weight as a row
    b2 = params[D_IN + 2:D_IN + 3, 0:1]             # [1, 1]

    # Layer 1 on the MXU (shared by all three forward passes).
    h = jnp.dot(x, w1, preferred_element_type=jnp.float32) + b1      # [B, 20]
    # relu(h * m / keep) == (m / keep) * relu(h) since the scaled mask is >= 0,
    # so relu and the second-layer weight multiply are hoisted out of the per-mask work.
    rw = jnp.maximum(h, 0.0) * w2                                    # [B, 20]

    # Layer 2 ([*,20]@[20,1]) as a VPU multiply + XLU lane reduce: no wasted MXU pass per head.
    o1 = jnp.sum(rw * m_cached, axis=-1, keepdims=True) + b2         # [B, 1]  cached mask
    o2 = jnp.sum(rw * m_cached, axis=-1, keepdims=True) + b2         # [B, 1]  same cached mask
    o3 = jnp.sum(rw * m_fresh, axis=-1, keepdims=True) + b2          # [B, 1]  fresh mask

    # Pack results into one lane-dense slab -> single full-width unmasked store, one output DMA.
    pad = jnp.zeros((B, OUT_LANES - 3), jnp.float32)
    out_ref[...] = jnp.concatenate([o1, o2, o3, pad], axis=-1)


def _pack_params(w1, b1, w2, b2):
    """Pack (w1[10,20], b1[1,20], w2[20,1], b2[1,1]) into one (16,128) f32 slab.

    Built ONCE per parameter set (outside the per-call path) and reused as a device buffer.
    """
    slab = jnp.zeros((PARAM_ROWS, PARAM_LANES), jnp.float32)
    slab = slab.at[0:D_IN, 0:D_HID].set(w1.astype(jnp.float32))
    slab = slab.at[D_IN, 0:D_HID].set(b1.reshape(-1).astype(jnp.float32))
    slab = slab.at[D_IN + 1, 0:D_HID].set(w2.reshape(-1).astype(jnp.float32))
    slab = slab.at[D_IN + 2, 0].set(jnp.asarray(b2, jnp.float32).reshape(()))
    return slab


def _make_scaled_masks(key, shape, p=P_DROP):
    """Bernoulli(1-p) keep-masks, pre-scaled by 1/(1-p) (training-mode dropout).

    Equivalent to torch.empty(shape, dtype=uint8).bernoulli_(1-p) followed by x*mask/(1-p);
    the uint8 cast + scale are fused into a single select.
    """
    keep = 1.0 - p
    k_cached, k_fresh = jax.random.split(key)
    m_cached = jnp.where(jax.random.bernoulli(k_cached, keep, shape),
                         jnp.float32(1.0 / keep), jnp.float32(0.0))
    m_fresh = jnp.where(jax.random.bernoulli(k_fresh, keep, shape),
                        jnp.float32(1.0 / keep), jnp.float32(0.0))
    return m_cached, m_fresh


@jax.jit
def test_repeatable_dropout_forward(x, param_slab, m_cached_scaled, m_fresh_scaled):
    """Jitted per-call path: slab packing + gridless pallas_call + output slicing all fuse."""
    B = x.shape[0]

    # One lane-dense activation slab: x | cached mask | fresh mask.  Under jit the zeros + 3
    # updates fuse into a single small copy, and it becomes one contiguous input DMA.
    act = jnp.zeros((B, ACT_LANES), jnp.float32)
    act = act.at[:, X_OFF:X_OFF + D_IN].set(x.astype(jnp.float32))
    act = act.at[:, MC_OFF:MC_OFF + D_HID].set(m_cached_scaled)
    act = act.at[:, MF_OFF:MF_OFF + D_HID].set(m_fresh_scaled)

    out = pl.pallas_call(
        _mlp_repeatable_dropout_kernel,
        out_shape=jax.ShapeDtypeStruct((B, OUT_LANES), jnp.float32),
        in_specs=[
            pl.BlockSpec(memory_space=pltpu.MemorySpace.VMEM),
            pl.BlockSpec(memory_space=pltpu.MemorySpace.VMEM),
        ],
        out_specs=pl.BlockSpec(memory_space=pltpu.MemorySpace.VMEM),
    )(act, param_slab)

    o1 = out[:, 0:1]
    o2 = out[:, 1:2]   # second pass through the same cached mask -> bit-identical to o1
    o3 = out[:, 2:3]
    return o1, o2, o3


if __name__ == "__main__":
    key = jax.random.PRNGKey(0)
    k_x, k_w1, k_b1, k_w2, k_b2, k_mask = jax.random.split(key, 6)

    B = 8
    bound1 = 1.0 / np.sqrt(D_IN)
    bound2 = 1.0 / np.sqrt(D_HID)

    x = jax.random.normal(k_x, (B, D_IN), dtype=jnp.float32)
    w1 = jax.random.uniform(k_w1, (D_IN, D_HID), jnp.float32, -bound1, bound1)
    b1 = jax.random.uniform(k_b1, (1, D_HID), jnp.float32, -bound1, bound1)
    w2 = jax.random.uniform(k_w2, (D_HID, D_OUT), jnp.float32, -bound2, bound2)
    b2 = jax.random.uniform(k_b2, (1, D_OUT), jnp.float32, -bound2, bound2)

    # Mask 0 -> cached (shared by o1 and o2); mask 1 -> fresh mask after reset_dropout() (o3).
    m_cached, m_fresh = _make_scaled_masks(k_mask, (B, D_HID))

    # Parameter slab is constant across the three passes and across calls: build once, reuse.
    param_slab = _pack_params(w1, b1, w2, b2)

    o1, o2, o3 = test_repeatable_dropout_forward(x, param_slab, m_cached, m_fresh)
    jax.block_until_ready((o1, o2, o3))

    assert o1.shape == (B, 1) and o2.shape == (B, 1) and o3.shape == (B, 1)
    # Repeatable dropout: the first two forward passes share the cached mask -> identical.
    assert bool(jnp.all(o1 == o2))

    # Pure-JAX reference of the exact same computation (dropout -> relu -> linear), same masks.
    h_ref = x @ w1 + b1
    ref1 = jnp.maximum(h_ref * m_cached, 0.0) @ w2 + b2
    ref3 = jnp.maximum(h_ref * m_fresh, 0.0) @ w2 + b2
    np.testing.assert_allclose(np.asarray(o1), np.asarray(ref1), rtol=1e-3, atol=1e-3)
    np.testing.assert_allclose(np.asarray(o3), np.asarray(ref3), rtol=1e-3, atol=1e-3)

    print("KERNEL_OK")
</pallas_src>

<mosaic_0001>
module attributes {stable_mosaic.version = 11 : i64} {
  func.func @_mlp_repeatable_dropout_kernel(%arg0: memref<8x128xf32, #tpu.memory_space<vmem>>, %arg1: memref<16x128xf32, #tpu.memory_space<vmem>>, %arg2: memref<8x128xf32, #tpu.memory_space<vmem>>) attributes {dimension_semantics = [], scalar_prefetch = 0 : i64, scratch_operands = 0 : i64, tpu.core_type = #tpu.core_type<tc>} {
    %c0 = arith.constant 0 : index
    %c0_0 = arith.constant 0 : index
    %0 = vector.load %arg0[%c0, %c0_0] : memref<8x128xf32, #tpu.memory_space<vmem>>, vector<8x128xf32>
    %c0_1 = arith.constant 0 : index
    %c0_2 = arith.constant 0 : index
    %1 = vector.load %arg1[%c0_1, %c0_2] : memref<16x128xf32, #tpu.memory_space<vmem>>, vector<16x128xf32>
    %2 = vector.extract_strided_slice %0 {offsets = [0, 0], sizes = [8, 10], strides = [1, 1]} : vector<8x128xf32> to vector<8x10xf32>
    %3 = vector.extract_strided_slice %0 {offsets = [0, 32], sizes = [8, 20], strides = [1, 1]} : vector<8x128xf32> to vector<8x20xf32>
    %4 = vector.extract_strided_slice %0 {offsets = [0, 64], sizes = [8, 20], strides = [1, 1]} : vector<8x128xf32> to vector<8x20xf32>
    %5 = vector.extract_strided_slice %1 {offsets = [0, 0], sizes = [10, 20], strides = [1, 1]} : vector<16x128xf32> to vector<10x20xf32>
    %6 = vector.extract_strided_slice %1 {offsets = [10, 0], sizes = [1, 20], strides = [1, 1]} : vector<16x128xf32> to vector<1x20xf32>
    %7 = vector.extract_strided_slice %1 {offsets = [11, 0], sizes = [1, 20], strides = [1, 1]} : vector<16x128xf32> to vector<1x20xf32>
    %8 = vector.extract_strided_slice %1 {offsets = [12, 0], sizes = [1, 1], strides = [1, 1]} : vector<16x128xf32> to vector<1x1xf32>
    %cst = arith.constant dense<0.000000e+00> : vector<8x20xf32>
    %9 = tpu.matmul %2, %5, %cst {dimension_numbers = #tpu.dot_dimension_numbers<[1], [0], [0], [1], [0, 0, 1, 1], [], []>} : vector<8x10xf32>, vector<10x20xf32>, vector<8x20xf32> -> vector<8x20xf32>
    %10 = vector.broadcast %6 : vector<1x20xf32> to vector<8x20xf32>
    %11 = arith.addf %9, %10 : vector<8x20xf32>
    %cst_3 = arith.constant 0.000000e+00 : f32
    %12 = vector.broadcast %cst_3 : f32 to vector<8x20xf32>
    %13 = arith.maximumf %11, %12 : vector<8x20xf32>
    %14 = vector.broadcast %7 : vector<1x20xf32> to vector<8x20xf32>
    %15 = arith.mulf %13, %14 : vector<8x20xf32>
    %16 = arith.mulf %15, %3 : vector<8x20xf32>
    %cst_4 = arith.constant dense<0.000000e+00> : vector<8xf32>
    %17 = vector.multi_reduction <add>, %16, %cst_4 [1] : vector<8x20xf32> to vector<8xf32>
    %18 = vector.shape_cast %17 : vector<8xf32> to vector<8x1xf32>
    %19 = vector.broadcast %8 : vector<1x1xf32> to vector<8x1xf32>
    %20 = arith.addf %18, %19 : vector<8x1xf32>
    %21 = arith.mulf %15, %3 : vector<8x20xf32>
    %cst_5 = arith.constant dense<0.000000e+00> : vector<8xf32>
    %22 = vector.multi_reduction <add>, %21, %cst_5 [1] : vector<8x20xf32> to vector<8xf32>
    %23 = vector.shape_cast %22 : vector<8xf32> to vector<8x1xf32>
    %24 = vector.broadcast %8 : vector<1x1xf32> to vector<8x1xf32>
    %25 = arith.addf %23, %24 : vector<8x1xf32>
    %26 = arith.mulf %15, %4 : vector<8x20xf32>
    %cst_6 = arith.constant dense<0.000000e+00> : vector<8xf32>
    %27 = vector.multi_reduction <add>, %26, %cst_6 [1] : vector<8x20xf32> to vector<8xf32>
    %28 = vector.shape_cast %27 : vector<8xf32> to vector<8x1xf32>
    %29 = vector.broadcast %8 : vector<1x1xf32> to vector<8x1xf32>
    %30 = arith.addf %28, %29 : vector<8x1xf32>
    %cst_7 = arith.constant 0.000000e+00 : f32
    %31 = vector.broadcast %cst_7 : f32 to vector<8x125xf32>
    %32 = tpu.concatenate %20, %25, %30, %31 in 1 : vector<8x1xf32>, vector<8x1xf32>, vector<8x1xf32>, vector<8x125xf32> -> vector<8x128xf32>
    %c0_8 = arith.constant 0 : index
    %c0_9 = arith.constant 0 : index
    %33 = vector.load %arg2[%c0_8, %c0_9] : memref<8x128xf32, #tpu.memory_space<vmem>>, vector<8x128xf32>
    tpu.vector_store %arg2[%c0_8, %c0_9], %32 {strides = array<i32>} : memref<8x128xf32, #tpu.memory_space<vmem>>, vector<8x128xf32>,
    return
  }
}

</mosaic_0001>

<bundles_post_ra>
// kernel: test_repeatable_dropout_forward.1
= control target key start
LH: loop header
LB: loop body
LE: loop exit
PB: predicated region body
PF: predicated region fallthrough
CT: control target
= control target key end

     0   :  { %vm22_vm0 = vcmask 1041408   ;;  %v160_v0 = vmov 0.0   ;;  %vm161_vm1 = vmmov 0   ;;  %vm18_vm2 = vcmask 80896   ;;  %s162_s15 = smov 96   ;;  %s163_s16 = smov 64   ;;  %s193_s1 = inlined_call_operand.vmem [shape: f32[16,128], index: 1, kind: input, shape index: {}]   ;;  %s194_s0 = inlined_call_operand.vmem [shape: f32[8,128], index: 0, kind: input, shape index: {}]   ;;  %s195_s2 = inlined_call_operand.vmem [shape: f32[8,128], index: 2, kind: output, shape index: {}]  }
   0x1   :  { %147 = vmatprep.subr.mxu0 %v160_v0  ;;  %v13_v1 = vld [vmem:[%s193_s1 + $0x8] sm:$0xff]  ;;  %v12_v2 = vld [vmem:[%s193_s1] sm:$0xff]  ;;  %151 = vmatprep.mubr.msk.f32.mxu0 %vm161_vm1, %v160_v0  ;;  %v14_v4 = vlaneseq  ;;  %vm106_vm3 = vcmask 162816   ;;  %s165_s1 = smov 2   ;;  %vm131_vm4 = vcmask 7168   ;;  %vm133_vm5 = vcmask 15360  }
   0x2   :  { %v11_v3 = vld [vmem:[%s194_s0] sm:$0xff]  ;;  %148 = vmatpush3.msk.msra.mxu0 %vm22_vm0, %v13_v1  ;;  %s164_s0 = smov 1   ;;  %vm135_vm6 = vcmask 23552  }
   0x3   :  { %102 = vrot.lane.b32.xlu0 %v11_v3, %s162_s15  ;;  %149 = vmatprep.subr.mxu0 %v160_v0  ;;  %v15_v5 = vshrl.u32 %v14_v4, 7 }
   0x4   :  { %150 = vmatpush3.msra.mxu0 %v12_v2 }
   0x5   :  { %152 = vmatmul.mubr.msk.f32.vlgmr.msra.gmra.mxu0 %vm18_vm2, %v11_v3  ;;  %v16_v6 = vsub.s32 2, %v15_v5  ;;  %v99_v8 = vsub.s32 3, %v15_v5  ;;  %v112_v21 = vsub.s32 4, %v15_v5 }
   0x7   :  { %115 = vrot.lane.b32.xlu0 %v11_v3, %s163_s16  ;;  %v17_v7 = vrot.slane %v13_v1, %v16_v6  ;;  %v100_v12 = vrot.slane %v13_v1, %v99_v8  ;;  %v113_v22 = vrot.slane %v13_v1, %v112_v21 }
  0x75   :  { %v103_v10 = vpop.permute.xlu0 %102 }
  0x79   :  { %v116_v16 = vpop.permute.xlu0 %115 }
  0xc5   :  { %v92_v9 = vpop.f32.mrf.mxu0 }
  0xc6   :  { %v93_v11 = vadd.f32 %v92_v9, %v17_v7 }
  0xc7   :  { %v153_v13 = vpop.f32.mrf.mxu0 }
  0xc8   :  { %v96_v14 = vmax.f32 %v93_v11, 0.0 }
  0xca   :  { %v101_v15 = vmul.f32 %v100_v12, %v96_v14 }
  0xcc   :  { %v105_v17 = vmul.f32 %v103_v10, %v101_v15  ;;  %v118_v18 = vmul.f32 %v116_v16, %v101_v15 }
  0xce   :  { %v107_v19 = vsel %vm106_vm3, %v105_v17, 0.0  ;;  %v119_v20 = vsel %vm106_vm3, %v118_v18, 0.0 }
  0xcf   :  { %108 = vadd.xlane.f32.xlu1 %v107_v19 }
  0xd3   :  { %120 = vadd.xlane.f32.xlu1 %v119_v20 }
 0x158   :  { %v109_v23 = vpop.xlane.xlu1 %108 }
 0x159   :  { %v114_v24 = vadd.f32 %v113_v22, %v109_v23 }
 0x15b   :  { %124 = vrot.lane.b32.xlu0 %v114_v24, %s164_s0 }
 0x15c   :  { %v121_v25 = vpop.xlane.xlu1 %120 }
 0x15d   :  { %v122_v26 = vadd.f32 %v121_v25, %v113_v22 }
 0x15f   :  { %128 = vrot.lane.b32.xlu1 %v122_v26, %s165_s1 }
 0x1cd   :  { %v125_v27 = vpop.permute.xlu0 %124 }
 0x1ce   :  { %v132_v28 = vsel %vm131_vm4, %v114_v24, %v125_v27 }
 0x1d1   :  { %v129_v29 = vpop.permute.xlu1 %128 }
 0x1d2   :  { %v134_v30 = vsel %vm133_vm5, %v132_v28, %v129_v29 }
 0x1d3   :  { %v136_v31 = vsel %vm135_vm6, %v134_v30, 0.0 }
 0x1d4   :  { %137 = vst [vmem:[%s195_s2] sm:$0xff] %v136_v31 }

</bundles_post_ra>
